<compile_context>
chip_gen: v6e
topology: v6e:2x2x1
jax: 0.10.0
libtpu: 0.0.40
codegen_flags: <defaults>
</compile_context>

<pallas_src>
import functools

import jax
import jax.numpy as jnp
from jax.experimental import pallas as pl
from jax.experimental.pallas import tpu as pltpu


# ---------------------------------------------------------------------------
# Kernel: out = dropout(emb + pe)   (pe broadcast over the batch axis)
# ---------------------------------------------------------------------------
def _pos_enc_kernel(seed_ref, emb_ref, pe_ref, out_ref, *, p_drop, apply_dropout):
    # Broadcast add in f32 ((tL,B,D) + (tL,1,D)); cast back to output dtype at
    # the end so bf16/f32 I/O both work with full-precision accumulation.
    x = emb_ref[...].astype(jnp.float32) + pe_ref[...].astype(jnp.float32)

    if apply_dropout:
        tL, B, D = out_ref.shape
        row0 = pl.program_id(0) * tL  # global row offset of this tile

        # Global element index (unique per (l, b, d) across the whole array).
        l_idx = jax.lax.broadcasted_iota(jnp.int32, (tL, B, D), 0) + row0
        b_idx = jax.lax.broadcasted_iota(jnp.int32, (tL, B, D), 1)
        d_idx = jax.lax.broadcasted_iota(jnp.int32, (tL, B, D), 2)
        gidx = ((l_idx * B + b_idx) * D + d_idx).astype(jnp.uint32)

        # Weyl step + lowbias32-style avalanche; mix the runtime seed in.
        h = gidx * jnp.uint32(0x9E3779B9) + seed_ref[0].astype(jnp.uint32)
        h = h ^ (h >> 16)
        h = h * jnp.uint32(0x7FEB352D)
        h = h ^ (h >> 15)
        h = h * jnp.uint32(0x846CA68B)
        h = h ^ (h >> 16)

        # Integer-threshold keep decision with fused scale (no int->float
        # convert, no extra multiply): drop iff h < p * 2^32.
        threshold = jnp.uint32(min(int(round(p_drop * (2.0 ** 32))), 2 ** 32 - 1))
        scale = jnp.float32(1.0 / (1.0 - p_drop))
        x = x * jnp.where(h >= threshold, scale, jnp.float32(0.0))

    out_ref[...] = x.astype(out_ref.dtype)


# ---------------------------------------------------------------------------
# Parameter setup (mirrors the given PositionalEncoding.__init__ exactly:
# pe[pos, j] uses frequency 10000^(-2j/dim); sin on even cols, cos on odd cols)
# ---------------------------------------------------------------------------
def make_pe(dim, max_len=5000):
    pos = jnp.arange(max_len, dtype=jnp.float32)[:, None]                 # (max_len, 1)
    div_term = 1.0 / jnp.power(
        10000.0, jnp.arange(0, dim * 2, 2, dtype=jnp.float32) / dim)      # (dim,)
    angles = pos * div_term                                               # (max_len, dim)
    col = jnp.arange(dim)
    pe = jnp.where((col % 2) == 0, jnp.sin(angles), jnp.cos(angles))
    return pe[:, None, :]                                                 # (max_len, 1, dim)


# ---------------------------------------------------------------------------
# Wrapper
# ---------------------------------------------------------------------------
def positional_encoding(emb, pe, *, dropout_p=0.0, training=True, seed=0,
                        tile_rows=None, vmem_limit_bytes=32 * 1024 * 1024):
    L, B, D = emb.shape
    pe_slice = pe[:L, :1, :D].astype(jnp.float32)                         # (L, 1, D)
    apply_dropout = bool(training) and float(dropout_p) > 0.0
    seed_arr = jnp.asarray([seed], dtype=jnp.int32)

    # Tile over L only, so the last two block dims (B, D) are always full
    # (satisfies the (8,128) rule for any B/D) and the output stays lane-dense
    # when D is a multiple of 128.  Target ~2 MiB per emb/out tile: big enough
    # to sit near the HBM roofline, small enough that double-buffered in+out
    # tiles plus the u32/f32 temporaries fit v7x's 64 MiB VMEM and v5e's
    # scoped budget.
    if tile_rows is None:
        target_bytes = 2 * 1024 * 1024
        row_bytes = B * D * emb.dtype.itemsize
        tile_rows = max(1, min(L, target_bytes // max(row_bytes, 1)))
        if tile_rows >= 8:
            tile_rows -= tile_rows % 8
    tL = int(tile_rows)
    grid = (pl.cdiv(L, tL),)

    kernel = functools.partial(
        _pos_enc_kernel, p_drop=float(dropout_p), apply_dropout=apply_dropout)

    return pl.pallas_call(
        kernel,
        out_shape=jax.ShapeDtypeStruct((L, B, D), emb.dtype),
        grid_spec=pltpu.PrefetchScalarGridSpec(
            num_scalar_prefetch=1,
            grid=grid,
            in_specs=[
                pl.BlockSpec((tL, B, D), lambda i, seed: (i, 0, 0)),
                pl.BlockSpec((tL, 1, D), lambda i, seed: (i, 0, 0)),
            ],
            out_specs=pl.BlockSpec((tL, B, D), lambda i, seed: (i, 0, 0)),
        ),
        compiler_params=pltpu.CompilerParams(
            # No cross-step state (the dropout mask is a pure function of the
            # global element index), so the L axis is safely "parallel" —
            # lets v7x shard the grid across its 2 TensorCores.
            dimension_semantics=("parallel",),
            vmem_limit_bytes=vmem_limit_bytes,
        ),
    )(seed_arr, emb, pe_slice)


if __name__ == "__main__":
    L, B, D = 64, 8, 128          # small test shapes; D multiple of 128 (lane-dense)
    dropout_p = 0.1
    max_len = 5000

    key = jax.random.PRNGKey(0)
    emb = jax.random.normal(key, (L, B, D), dtype=jnp.float32)
    pe = make_pe(D, max_len=max_len)

    ref = emb + pe[:L, :1, :D]

    # 1) Eval path (dropout off), tiled grid of 4 steps: exact match vs JAX ref.
    out_eval = positional_encoding(emb, pe, dropout_p=dropout_p,
                                   training=False, tile_rows=16)
    out_eval = jax.block_until_ready(out_eval)
    assert jnp.allclose(out_eval, ref, atol=1e-5, rtol=1e-5), "mismatch vs reference"

    # 2) Training path: every element is 0 or ref/(1-p); drop rate sane.
    out_train = positional_encoding(emb, pe, dropout_p=dropout_p,
                                    training=True, seed=123, tile_rows=16)
    out_train = jax.block_until_ready(out_train)
    scaled = ref / (1.0 - dropout_p)
    is_zero = jnp.isclose(out_train, 0.0, atol=1e-6)
    is_scaled = jnp.isclose(out_train, scaled, atol=1e-4, rtol=1e-4)
    assert bool(jnp.all(jnp.logical_or(is_zero, is_scaled))), \
        "dropout output not in {0, x/(1-p)}"
    drop_frac = float(jnp.mean(is_zero.astype(jnp.float32)))
    assert 0.02 < drop_frac < 0.30, f"implausible drop fraction {drop_frac}"

    # 3) Deterministic given the same seed (and independent of tiling).
    out_train2 = jax.block_until_ready(
        positional_encoding(emb, pe, dropout_p=dropout_p,
                            training=True, seed=123, tile_rows=32))
    assert jnp.array_equal(out_train, out_train2), "dropout mask not tiling-invariant"

    print("KERNEL_OK")
</pallas_src>

<mosaic_0001>
module attributes {stable_mosaic.version = 11 : i64} {
  func.func @_pos_enc_kernel(%arg0: i32, %arg1: memref<1xi32, #tpu.memory_space<smem>>, %arg2: memref<16x8x128xf32, #tpu.memory_space<vmem>>, %arg3: memref<16x1x128xf32, #tpu.memory_space<vmem>>, %arg4: memref<16x8x128xf32, #tpu.memory_space<vmem>>) attributes {dimension_semantics = [#tpu.dimension_semantics<parallel>], iteration_bounds = array<i64: 4>, scalar_prefetch = 1 : i64, scratch_operands = 0 : i64, tpu.core_type = #tpu.core_type<tc>, window_params = [{transform_indices = @transform_0, window_bounds = array<i64: 16, 8, 128>}, {transform_indices = @transform_1, window_bounds = array<i64: 16, 1, 128>}, {transform_indices = @transform_2, window_bounds = array<i64: 16, 8, 128>}]} {
    %c0 = arith.constant 0 : index
    %c0_0 = arith.constant 0 : index
    %c0_1 = arith.constant 0 : index
    %0 = vector.load %arg2[%c0, %c0_0, %c0_1] : memref<16x8x128xf32, #tpu.memory_space<vmem>>, vector<16x8x128xf32>
    %c0_2 = arith.constant 0 : index
    %c0_3 = arith.constant 0 : index
    %c0_4 = arith.constant 0 : index
    %1 = vector.load %arg3[%c0_2, %c0_3, %c0_4] : memref<16x1x128xf32, #tpu.memory_space<vmem>>, vector<16x1x128xf32>
    %2 = vector.broadcast %1 : vector<16x1x128xf32> to vector<16x8x128xf32>
    %3 = arith.addf %0, %2 : vector<16x8x128xf32>
    %c0_5 = arith.constant 0 : index
    %c0_6 = arith.constant 0 : index
    %c0_7 = arith.constant 0 : index
    %4 = vector.load %arg4[%c0_5, %c0_6, %c0_7] : memref<16x8x128xf32, #tpu.memory_space<vmem>>, vector<16x8x128xf32>
    tpu.vector_store %arg4[%c0_5, %c0_6, %c0_7], %3 {strides = array<i32>} : memref<16x8x128xf32, #tpu.memory_space<vmem>>, vector<16x8x128xf32>,
    return
  }
  func.func @transform_0(%arg0: i32, %arg1: memref<1xi32, #tpu.memory_space<smem>>) -> (i32, i32, i32) {
    %c0_i32 = arith.constant 0 : i32
    %c0_i32_0 = arith.constant 0 : i32
    %c0_i32_1 = arith.constant 0 : i32
    return %arg0, %c0_i32, %c0_i32_0 : i32, i32, i32
  }
  func.func @transform_1(%arg0: i32, %arg1: memref<1xi32, #tpu.memory_space<smem>>) -> (i32, i32, i32) {
    %c0_i32 = arith.constant 0 : i32
    %c0_i32_0 = arith.constant 0 : i32
    %c0_i32_1 = arith.constant 0 : i32
    return %arg0, %c0_i32, %c0_i32_0 : i32, i32, i32
  }
  func.func @transform_2(%arg0: i32, %arg1: memref<1xi32, #tpu.memory_space<smem>>) -> (i32, i32, i32) {
    %c0_i32 = arith.constant 0 : i32
    %c0_i32_0 = arith.constant 0 : i32
    %c0_i32_1 = arith.constant 0 : i32
    return %arg0, %c0_i32, %c0_i32_0 : i32, i32, i32
  }
}

</mosaic_0001>

<bundles_post_ra>
// kernel: tpu_custom_call.1
= control target key start
LH: loop header
LB: loop body
LE: loop exit
PB: predicated region body
PF: predicated region fallthrough
CT: control target
= control target key end

     0   :  { %9 = vsyncpa [#allocation5], 0  ;;  %s988_s0 = inlined_call_operand.<no memory space> [shape: s32[1], index: 0, kind: input, shape index: {}]   ;;  %s989_s1 = inlined_call_operand.hbm [shape: f32[64,8,128], index: 1, kind: input, shape index: {}]   ;;  %s990_s2 = inlined_call_operand.hbm [shape: f32[64,1,128], index: 2, kind: input, shape index: {}]   ;;  %s991_s3 = inlined_call_operand.hbm [shape: f32[64,8,128], index: 3, kind: output, shape index: {}]  }
   0x1   :  { %11 = vsyncpa [#allocation5 + $0x1], 0 }
   0x2   :  { %12 = vsyncpa [#allocation8], 0 }
   0x3   :  { %14 = vsyncpa [#allocation8 + $0x1], 0 }
   0x4   :  { %15 = vsyncpa [#allocation6], 0 }
   0x5   :  { %17 = vsyncpa [#allocation6 + $0x1], 0  ;;  %s726_s12 = smov 0   ;;  %s728_s13 = smov 0  }
   0x6   :  { %s730_s0 = smov 0   ;;  %s732_s14 = smov 0  }
   0x7 LB: > { %s747_s15 = sadd.s32 4294967295, %s695_s14   ;;  %s477_s16 = sadd.s32 4294967294, %s695_s14   ;;  %s695_s14 = sphi %s732_s14, %s1006_s14   ;;  %s691_s0 = sphi %s730_s0, %s1005_s0   ;;  %s687_s13 = sphi %s728_s13, %s1004_s13   ;;  %s683_s12 = sphi %s726_s12, %s1003_s12  }
   0x8   : > { %s751_s17 = sadd.s32 1, %s695_s14   ;;  %s30_s18 = sadd.s32 1, %s691_s0 }
   0x9   : > { %s27_s19 = ssub.s32 %s695_s14, %s751_s17  ;;  %p37_p0 = scmp.ne.s32.totalorder %s691_s0, %s687_s13 }
   0xa   : > { %p28_p1 = scmp.eq.s32.totalorder %s27_s19, 0  ;;  %p38_p2 = scmp.eq.s32.totalorder %s695_s14, 0 }
   0xb   : > { %p43_p3 = scmp.ne.s32.totalorder %s687_s13, %s683_s12  ;;  %p44_p4 = scmp.eq.s32.totalorder %s747_s15, 0 }
   0xc   : > { %s763_s20 = scalar_select %p28_p1, %s691_s0, %s30_s18  }
   0xd   : > { %p765_p5 = por %p38_p2, %p37_p0  ;;  %p769_p6 = por %p44_p4, %p43_p3 }
   0xe   : > { %p93_p7 = scmp.eq.s32.totalorder %s747_s15, 3  ;;  %p99_p8 = scmp.eq.s32.totalorder %s477_s16, 3 }
   0xf   : > { %s995_s22 = scalar_select %p769_p6, 1, 0 }
  0x10   : > { %p531_p9 = scmp.lt.s32.totalorder %s695_s14, 4  ;;  %p775_p10 = por %p93_p7, %p37_p0 }
  0x11   : > { %p779_p11 = por %p99_p8, %p43_p3  ;;  %s784_s25 = sand.u32 1, %s691_s0  }
  0x12   : > { %s996_s23 = scalar_select %p775_p10, 1, 0 }
  0x13   : > { %s997_s24 = scalar_select %p779_p11, 1, 0 }
  0x14   : > { %s511_s26 = sshll.u32 %s695_s14, 11  ;;  %s480_s27 = sshll.u32 %s784_s25, 7 }
  0x15   : > { %s791_s30 = scalar_lea.hbm %s989_s1, %s511_s26  ;;  %s123_s4 = scalar_lea.vmem [#allocation4], %s480_s27 }
  0x16   : > { %s130_s5 = sshll.u32 %s123_s4, 4  ;;  %p795_p12 = pnand %p531_p9, %p765_p5  ;;  %s799_s5 = int_to_ptr.vmem [resolvable:$true] %s130_s5 }
  0x17   : > { %s120_s7 = scalar_lea.sflag [#allocation5], %s784_s25  ;;  %s571_s8 = scalar_lea.hbm %s791_s30, 2048 }
  0x18   : > { %p572_p13 = scmp.ne.s32.totalorder %s791_s30, %s571_s8  ;;  %p573_p0 = pneg %p795_p12 }
  0x19   : > { %s576_s11 = scalar_lea.hbm %s989_s1, 8192  ;;  %p577_p3 = scmp.lt.s32.totalorder %s791_s30, %s989_s1 }
  0x1a   : > { %p574_p1 = pnand %p573_p0, %p572_p13  ;;  %p578_p4 = scmp.lt.s32.totalorder %s576_s11, %s571_s8 }
  0x1c   : > { %p575_p2 = pneg %p574_p1  ;;  %p579_p5 = por %p578_p4, %p577_p3 }
  0x1e   : > { %p580_p7 = pnand %p579_p5, %p575_p2 }
  0x20   : > { %583 = shalt.err (!%p580_p7)
}
  0x21   : > { %s584_s19 = scalar_lea.vmem %s799_s5, 2048  ;;  %s697_s21 = smov [#allocation4]  }
  0x22   : > { %p585_p8 = scmp.ne.s32.totalorder %s799_s5, %s584_s19  ;;  %s589_s26 = sshll.u32 %s697_s21, 4  ;;  %s590_s26 = int_to_ptr.vmem [resolvable:$false] %s589_s26 }
  0x23   : > { %s591_s27 = scalar_lea.vmem %s590_s26, 4096  ;;  %p592_p1 = scmp.lt.s32.totalorder %s799_s5, %s590_s26 }
  0x24   : > { %p587_p9 = pnand %p585_p8, %p573_p0  ;;  %p593_p11 = scmp.lt.s32.totalorder %s591_s27, %s584_s19 }
  0x26   : > { %p588_p13 = pneg %p587_p9  ;;  %p594_p10 = por %p593_p11, %p592_p1 }
  0x28   : > { %p595_p3 = pnand %p594_p10, %p588_p13 }
  0x2a   : > { %598 = shalt.err (!%p595_p3)
}
  0x2b   : > { %s698_s28 = smov 128   ;;  %s699_s29 = smov 8  }
  0x2c   : > { %523 = dma.hbm_to_vmem [thread:$0]  (!%p795_p12), %s791_s30, 2048, %s799_s5, %s120_s7, %s698_s28, %s698_s28, %s699_s29  }
  0x2d   : > { %p486_p2 = scmp.ge.s32.totalorder %s695_s14, 1  ;;  %p159_p4 = scmp.lt.s32.totalorder %s695_s14, 5 }
  0x2e   : > { %s483_s4 = sshll.u32 %s784_s25, 4  ;;  %s512_s9 = sshll.u32 %s695_s14, 8 }
  0x2f   : > { %p831_p10 = pnand %p486_p2, %p159_p4  ;;  %s144_s10 = scalar_lea.vmem [#allocation7], %s483_s4 }
  0x30   : > { %s151_s11 = sshll.u32 %s144_s10, 4  ;;  %s839_s19 = scalar_lea.hbm %s990_s2, %s512_s9  ;;  %s841_s11 = int_to_ptr.vmem [resolvable:$true] %s151_s11 }
  0x31   : > { %s141_s30 = scalar_lea.sflag [#allocation8], %s784_s25  ;;  %s599_s5 = scalar_lea.hbm %s839_s19, 256 }
  0x32   : > { %p600_p11 = scmp.ne.s32.totalorder %s839_s19, %s599_s5  ;;  %s604_s26 = scalar_lea.hbm %s990_s2, 1024 }
  0x33   : > { %p605_p8 = scmp.lt.s32.totalorder %s839_s19, %s990_s2  ;;  %p606_p9 = scmp.lt.s32.totalorder %s604_s26, %s599_s5 }
  0x34   : > { %p602_p5 = pnand %p600_p11, %p573_p0 }
  0x35   : > { %p607_p13 = por %p606_p9, %p605_p8 }
  0x36   : > { %p603_p7 = pneg %p602_p5 }
  0x38   : > { %p608_p1 = pnand %p607_p13, %p603_p7 }
  0x3a   : > { %611 = shalt.err (!%p608_p1)
}
  0x3b   : > { %s612_s29 = scalar_lea.vmem %s841_s11, 256  ;;  %s700_s4 = smov [#allocation7]  }
  0x3c   : > { %p613_p3 = scmp.ne.s32.totalorder %s841_s11, %s612_s29  ;;  %s617_s9 = sshll.u32 %s700_s4, 4  ;;  %s618_s9 = int_to_ptr.vmem [resolvable:$false] %s617_s9 }
  0x3d   : > { %s619_s10 = scalar_lea.vmem %s618_s9, 512  ;;  %p620_p11 = scmp.lt.s32.totalorder %s841_s11, %s618_s9 }
  0x3e   : > { %p615_p2 = pnand %p613_p3, %p573_p0  ;;  %p621_p5 = scmp.lt.s32.totalorder %s619_s10, %s612_s29 }
  0x40   : > { %p616_p4 = pneg %p615_p2  ;;  %p622_p6 = por %p621_p5, %p620_p11 }
  0x42   : > { %p623_p8 = pnand %p622_p6, %p616_p4 }
  0x44   : > { %626 = shalt.err (!%p623_p8)
}
  0x45   : > { %s701_s16 = smov 16   ;;  %s702_s18 = smov 1  }
  0x46   : > { %526 = dma.hbm_to_vmem [thread:$0]  (!%p795_p12), %s839_s19, 256, %s841_s11, %s141_s30, %s701_s16, %s701_s16, %s702_s18  }
  0x47   : > { %163 = sbr.rel (%p831_p10) target bundleno = 110 (0x6e), region = 28  ;;  %s871_s5 = sand.u32 (!%p831_p10), 1, %s687_s13  }
  0x48   : > { %s487_s7 = sshll.u32 (!%p831_p10), %s871_s5, 7  ;;  %s166_s21 = scalar_lea.sflag (!%p831_p10), [#allocation5], %s871_s5 }
  0x49   : > { %s875_s26 = scalar_lea.vmem (!%p831_p10), [#allocation4], %s487_s7  ;;  %p1000_p6 = scmp.ne.s32.totalorder (!%p831_p10), %s995_s22, 0 }
  0x4c   : > { %670 = dma.done.wait (%p1000_p6), %s166_s21, 2048  }
  0x4d   : > { %672 = vsyncadd (%p1000_p6), %s166_s21, 4294965248  ;;  %s488_s25 = sshll.u32 %s871_s5, 4  ;;  %s175_s6 = scalar_lea.sflag [#allocation8], %s871_s5 }
  0x4e   : > { %s883_s8 = scalar_lea.vmem [#allocation7], %s488_s25 }
  0x4f   : > { %674 = dma.done.wait (%p1000_p6), %s175_s6, 256  }
  0x50   : > { %676 = vsyncadd (%p1000_p6), %s175_s6, 4294967040  ;;  %v207_v0 = vld [vmem:[%s875_s26] sm:$0xff]  ;;  %v208_v2 = vld [vmem:[%s875_s26 + $0x8] sm:$0xff]  ;;  %s898_s22 = scalar_lea.vmem [#allocation9], %s487_s7  ;;  %s513_s11 = sshll.u32 %s747_s15, 11 }
  0x51   : > { %v490_v1 = vld [vmem:[%s883_s8] ss:$0 sm:$0xff]  ;;  %v491_v4 = vld [vmem:[%s883_s8 + $0x1] ss:$0 sm:$0xff]  ;;  %v492_v6 = vld [vmem:[%s883_s8 + $0x2] ss:$0 sm:$0xff]  ;;  %s940_s27 = scalar_lea.hbm %s991_s3, %s513_s11 }
  0x52   : > { %v335_v3 = vadd.f32 %v490_v1, %v207_v0  ;;  %v209_v5 = vld [vmem:[%s875_s26 + $0x10] sm:$0xff]  ;;  %v336_v7 = vadd.f32 %v491_v4, %v208_v2  ;;  %v210_v9 = vld [vmem:[%s875_s26 + $0x18] sm:$0xff]  ;;  %v211_v11 = vld [vmem:[%s875_s26 + $0x20] sm:$0xff]  ;;  %s381_s19 = sshll.u32 %s898_s22, 4  ;;  %s368_s28 = scalar_lea.sflag [#allocation6], %s871_s5  ;;  %s942_s19 = int_to_ptr.vmem [resolvable:$true] %s381_s19 }
  0x53   : > { %v337_v8 = vadd.f32 %v492_v6, %v209_v5  ;;  %v493_v10 = vld [vmem:[%s883_s8 + $0x3] ss:$0 sm:$0xff]  ;;  %v494_v13 = vld [vmem:[%s883_s8 + $0x4] ss:$0 sm:$0xff]  ;;  %v212_v14 = vld [vmem:[%s875_s26 + $0x28] sm:$0xff]  ;;  %s627_s29 = scalar_lea.vmem %s942_s19, 2048 }
  0x54   : > { %351 = vst [vmem:[%s898_s22] sm:$0xff] %v335_v3  ;;  %v338_v12 = vadd.f32 %v493_v10, %v210_v9  ;;  %v495_v15 = vld [vmem:[%s883_s8 + $0x5] ss:$0 sm:$0xff]  ;;  %352 = vst [vmem:[%s898_s22 + $0x8] sm:$0xff] %v336_v7  ;;  %v339_v16 = vadd.f32 %v494_v13, %v211_v11  ;;  %v496_v19 = vld [vmem:[%s883_s8 + $0x6] ss:$0 sm:$0xff]  ;;  %p628_p12 = scmp.ne.s32.totalorder %s942_s19, %s627_s29  ;;  %p1001_p0 = scmp.ne.s32.totalorder %s996_s23, 0 }
  0x55   : > { %353 = vst [vmem:[%s898_s22 + $0x10] sm:$0xff] %v337_v8  ;;  %v340_v17 = vadd.f32 %v495_v15, %v212_v14  ;;  %v213_v18 = vld [vmem:[%s875_s26 + $0x30] sm:$0xff]  ;;  %v214_v20 = vld [vmem:[%s875_s26 + $0x38] sm:$0xff]  ;;  %v215_v23 = vld [vmem:[%s875_s26 + $0x40] sm:$0xff]  ;;  %s703_s4 = smov [#allocation9]  }
  0x56   : > { %354 = vst [vmem:[%s898_s22 + $0x18] sm:$0xff] %v338_v12  ;;  %v341_v21 = vadd.f32 %v496_v19, %v213_v18  ;;  %v497_v22 = vld [vmem:[%s883_s8 + $0x7] ss:$0 sm:$0xff]  ;;  %v498_v24 = vld [vmem:[%s883_s8 + $0x8] ss:$0 sm:$0xff]  ;;  %355 = vst [vmem:[%s898_s22 + $0x20] sm:$0xff] %v339_v16  ;;  %p629_p10 = pnand %p628_p12, %p1001_p0 }
  0x57   : > { %356 = vst [vmem:[%s898_s22 + $0x28] sm:$0xff] %v340_v17  ;;  %v342_v25 = vadd.f32 %v497_v22, %v214_v20  ;;  %v343_v26 = vadd.f32 %v498_v24, %v215_v23  ;;  %v216_v27 = vld [vmem:[%s875_s26 + $0x48] sm:$0xff]  ;;  %v217_v29 = vld [vmem:[%s875_s26 + $0x50] sm:$0xff]  ;;  %v218_v32 = vld [vmem:[%s875_s26 + $0x58] sm:$0xff]  ;;  %s631_s9 = sshll.u32 %s703_s4, 4  ;;  %s632_s9 = int_to_ptr.vmem [resolvable:$false] %s631_s9 }
  0x58   : > { %v499_v28 = vld [vmem:[%s883_s8 + $0x9] ss:$0 sm:$0xff]  ;;  %357 = vst [vmem:[%s898_s22 + $0x30] sm:$0xff] %v341_v21  ;;  %v500_v31 = vld [vmem:[%s883_s8 + $0xa] ss:$0 sm:$0xff]  ;;  %v219_v36 = vld [vmem:[%s875_s26 + $0x60] sm:$0xff]  ;;  %p630_p7 = pneg %p629_p10  ;;  %p634_p9 = scmp.lt.s32.totalorder %s942_s19, %s632_s9 }
  0x59   : > { %v344_v30 = vadd.f32 %v499_v28, %v216_v27  ;;  %v501_v33 = vld [vmem:[%s883_s8 + $0xb] ss:$0 sm:$0xff]  ;;  %358 = vst [vmem:[%s898_s22 + $0x38] sm:$0xff] %v342_v25  ;;  %359 = vst [vmem:[%s898_s22 + $0x40] sm:$0xff] %v343_v26  ;;  %v345_v34 = vadd.f32 %v500_v31, %v217_v29  ;;  %v502_v37 = vld [vmem:[%s883_s8 + $0xc] ss:$0 sm:$0xff] }
  0x5a   : > { %v346_v35 = vadd.f32 %v501_v33, %v218_v32  ;;  %v220_v38 = vld [vmem:[%s875_s26 + $0x68] sm:$0xff]  ;;  %v347_v39 = vadd.f32 %v502_v37, %v219_v36  ;;  %v221_v41 = vld [vmem:[%s875_s26 + $0x70] sm:$0xff]  ;;  %v222_v45 = vld [vmem:[%s875_s26 + $0x78] sm:$0xff]  ;;  %s633_s10 = scalar_lea.vmem %s632_s9, 4096 }
  0x5b   : > { %360 = vst [vmem:[%s898_s22 + $0x48] sm:$0xff] %v344_v30  ;;  %v503_v40 = vld [vmem:[%s883_s8 + $0xd] ss:$0 sm:$0xff]  ;;  %v504_v42 = vld [vmem:[%s883_s8 + $0xe] ss:$0 sm:$0xff]  ;;  %361 = vst [vmem:[%s898_s22 + $0x50] sm:$0xff] %v345_v34  ;;  %p635_p13 = scmp.lt.s32.totalorder %s633_s10, %s627_s29 }
  0x5c   : > { %362 = vst [vmem:[%s898_s22 + $0x58] sm:$0xff] %v346_v35  ;;  %v348_v43 = vadd.f32 %v503_v40, %v220_v38  ;;  %v349_v44 = vadd.f32 %v504_v42, %v221_v41  ;;  %v505_v46 = vld [vmem:[%s883_s8 + $0xf] ss:$0 sm:$0xff]  ;;  %363 = vst [vmem:[%s898_s22 + $0x60] sm:$0xff] %v347_v39 }
  0x5d   : > { %v350_v47 = vadd.f32 %v505_v46, %v222_v45  ;;  %p636_p1 = por %p635_p13, %p634_p9 }
  0x5e   : > { %364 = vst [vmem:[%s898_s22 + $0x68] sm:$0xff] %v348_v43  ;;  %365 = vst [vmem:[%s898_s22 + $0x70] sm:$0xff] %v349_v44 }
  0x5f   : > { %366 = vst [vmem:[%s898_s22 + $0x78] sm:$0xff] %v350_v47  ;;  %p637_p3 = pnand %p636_p1, %p630_p7 }
  0x61   : > { %640 = shalt.err (!%p637_p3)
}
  0x62   : > { %s641_s16 = scalar_lea.hbm %s940_s27, 2048  ;;  %s645_s21 = scalar_lea.hbm %s991_s3, 8192 }
  0x63   : > { %p642_p2 = scmp.ne.s32.totalorder %s940_s27, %s641_s16  ;;  %p646_p5 = scmp.lt.s32.totalorder %s940_s27, %s991_s3 }
  0x64   : > { %p647_p8 = scmp.lt.s32.totalorder %s645_s21, %s641_s16 }
  0x65   : > { %p643_p4 = pnand %p642_p2, %p1001_p0 }
  0x66   : > { %p648_p6 = por %p647_p8, %p646_p5 }
  0x67   : > { %p644_p11 = pneg %p643_p4 }
  0x69   : > { %p649_p12 = pnand %p648_p6, %p644_p11 }
  0x6b   : > { %652 = shalt.err (!%p649_p12)
}
  0x6c   : > { %s704_s6 = smov 128   ;;  %s705_s8 = smov 8  }
  0x6d   : > { %518 = dma.vmem_to_hbm [thread:$0]  (%p1001_p0), %s942_s19, 2048, %s940_s27, %s368_s28, %s704_s6, %s704_s6, %s705_s8  }
  0x6e PF: > { %p532_p10 = scmp.ge.s32.totalorder %s695_s14, 2  ;;  %s396_s22 = sand.u32 1, %s683_s12  }
  0x6f   : > { %p1002_p7 = scmp.ne.s32.totalorder %s997_s24, 0  ;;  %s397_s11 = scalar_lea.sflag [#allocation6], %s396_s22 }
  0x71   : > { %p528_p9 = pnand %p532_p10, %p1002_p7 }
  0x73   : > { %p529_p13 = pneg %p528_p9 }
  0x75   : > { %678 = dma.done.wait (%p529_p13), %s397_s11, 2048  }
  0x76   : > { %680 = vsyncadd (%p529_p13), %s397_s11, 4294965248  ;;  %p20_p1 = scmp.ge.s32.totalorder %s751_s17, 6   ;;  %s1003_s12 = smov %s687_s13 }
  0x77   : > { %s1004_s13 = smov %s691_s0  ;;  %s1005_s0 = smov %s763_s20 }
  0x78   : > { %s1006_s14 = smov %s751_s17  ;;  %22 = sbr.rel (!%p20_p1) target bundleno = 7 (0x7), region = 86 }
  0x7d   :  { %402 = vsyncpa [#allocation5], 1 }
  0x7e   :  { %404 = vsyncpa [#allocation5 + $0x1], 1 }
  0x7f   :  { %405 = vsyncpa [#allocation8], 1 }
  0x80   :  { %407 = vsyncpa [#allocation8 + $0x1], 1 }
  0x81   :  { %408 = vsyncpa [#allocation6], 1 }
  0x82   :  { %410 = vsyncpa [#allocation6 + $0x1], 1 }

</bundles_post_ra>
